<compile_context>
chip_gen: v6e
topology: v6e:2x2x1
jax: 0.10.0
libtpu: 0.0.40
codegen_flags: <defaults>
</compile_context>

<pallas_src>
import functools

import jax
import jax.numpy as jnp
from jax import lax
from jax.experimental import pallas as pl
from jax.experimental.pallas import tpu as pltpu


def _round_up(x, m):
    return ((x + m - 1) // m) * m


def _cdiv(a, b):
    return (a + b - 1) // b


def _gelu(h, approx):
    if approx:
        # tanh approximation: tanh goes to the EUP slot (cheap on v6e/v7x).
        # NOTE: slightly different numerics than torch.nn.GELU()'s exact erf.
        c0 = jnp.float32(0.7978845608028654)
        c1 = jnp.float32(0.044715)
        return 0.5 * h * (1.0 + jnp.tanh(c0 * (h + c1 * h * h * h)))
    # Exact (erf-based) GELU -- matches torch.nn.GELU() default numerics.
    return 0.5 * h * (1.0 + lax.erf(h * jnp.float32(0.7071067811865476)))


def _mlp_kernel_fused(x_ref, w1_ref, b1_ref, w2_ref, b2_ref, o_ref, *,
                      approx_gelu):
    """Single hidden step: weights fully resident, no accumulator scratch."""
    x = x_ref[...]
    h = jnp.dot(x, w1_ref[...], preferred_element_type=jnp.float32) + b1_ref[...]
    h = _gelu(h, approx_gelu)
    y = jnp.dot(h.astype(w2_ref.dtype), w2_ref[...],
                preferred_element_type=jnp.float32) + b2_ref[...]
    o_ref[...] = y.astype(o_ref.dtype)


def _mlp_kernel_tiled(x_ref, w1_ref, b1_ref, w2_ref, b2_ref, o_ref, acc_ref, *,
                      approx_gelu):
    """Hidden dim tiled along grid axis 1; fc2 partials accumulate in f32."""
    j = pl.program_id(1)

    @pl.when(j == 0)
    def _init():
        acc_ref[...] = jnp.zeros_like(acc_ref)

    x = x_ref[...]
    h = jnp.dot(x, w1_ref[...], preferred_element_type=jnp.float32) + b1_ref[...]
    h = _gelu(h, approx_gelu)
    acc_ref[...] += jnp.dot(h.astype(w2_ref.dtype), w2_ref[...],
                            preferred_element_type=jnp.float32)

    @pl.when(j == pl.num_programs(1) - 1)
    def _finalize():
        o_ref[...] = (acc_ref[...] + b2_ref[...]).astype(o_ref.dtype)


def _vmem_budget_bytes():
    """Per-core VMEM budget with headroom. Falls back to the smallest current
    generation (v7x: 64 MiB per TC) if the hardware query is unavailable."""
    cap = 64 * 1024 * 1024
    try:
        info = pltpu.get_tpu_info()
        q = getattr(info, "vmem_capacity_bytes", None)
        if q:
            cap = int(q)
    except Exception:
        pass
    return (cap * 7) // 8  # ~12.5% headroom for Mosaic internal scratch


@functools.partial(
    jax.jit,
    static_argnames=("compute_dtype", "tm_max", "th", "vmem_limit_bytes",
                     "approx_gelu"))
def mlp_pallas(x, w1, b1, w2, b2, *, compute_dtype=jnp.bfloat16, tm_max=1024,
               th=None, vmem_limit_bytes=None, approx_gelu=False):
    """x: (B, N, C_in); w1: (C_in, H); b1: (H,); w2: (H, C_out); b2: (C_out,).

    Weights are stored pre-transposed as (in, out) so the kernel computes
    x @ W + b, matching PyTorch's x @ W.T + b.  Matmuls run in `compute_dtype`
    (bf16 by default) with f32 accumulation; output keeps x.dtype.
    """
    B, N, C_in = x.shape
    H = w1.shape[1]
    C_out = w2.shape[1]
    M = B * N
    out_dtype = x.dtype
    cdt = jnp.dtype(compute_dtype)
    cbytes = cdt.itemsize
    obytes = jnp.dtype(out_dtype).itemsize

    budget = (_vmem_budget_bytes() if vmem_limit_bytes is None
              else int(vmem_limit_bytes))

    # ---- Lane-dense feature padding (last dims -> multiples of 128) --------
    C_in_p = _round_up(C_in, 128)
    C_out_p = _round_up(C_out, 128)
    H_p128 = _round_up(H, 128)

    # ---- Hidden-axis strategy ----------------------------------------------
    # If both (padded, double-buffered) weight matrices fit in <= 1/3 of the
    # budget, keep them fully resident: the hidden grid axis collapses to one
    # step and the weights are streamed from HBM exactly once.
    full_w_bytes = 2 * (C_in_p * H_p128 + H_p128 * C_out_p) * cbytes
    if th is None:
        fuse_hidden = full_w_bytes <= budget // 3
        th_eff = H_p128 if fuse_hidden else min(512, H_p128)
    else:
        th_eff = min(_round_up(th, 128), H_p128)
        fuse_hidden = th_eff >= H_p128
    H_p = H_p128 if fuse_hidden else _round_up(H, th_eff)

    # ---- Token tile selection ------------------------------------------------
    # Size tm to the VMEM budget (x/out double buffers, fc1 activations, acc),
    # split M evenly (no ragged-padding waste), and keep >= 2 token tiles when
    # there's enough work so both v7x TensorCores are busy.
    w_slice_bytes = 2 * (C_in_p * th_eff + th_eff * C_out_p) * cbytes
    per_row_bytes = (2 * C_in_p * cbytes            # x tile (double-buffered)
                     + 2 * C_out_p * obytes         # out tile (double-buffered)
                     + th_eff * (4 + cbytes)        # fc1 acts: f32 + cast copy
                     + (0 if fuse_hidden else 4 * C_out_p))   # f32 accumulator
    avail = budget - w_slice_bytes - (2 << 20)      # slack for biases / misc
    tm_cap = max(8, min(tm_max, (avail // per_row_bytes) // 8 * 8))
    n_row_tiles = _cdiv(M, tm_cap)
    if n_row_tiles == 1 and M > 256:
        n_row_tiles = 2
    tm = _round_up(_cdiv(M, n_row_tiles), 8)
    M_p = n_row_tiles * tm

    # ---- Pad / cast only when actually needed (zeros are exact no-ops) ------
    x2d = x.reshape(M, C_in)
    if x2d.dtype != cdt:
        x2d = x2d.astype(cdt)
    if (M_p, C_in_p) != (M, C_in):
        x2d = jnp.pad(x2d, ((0, M_p - M), (0, C_in_p - C_in)))

    w1_p = w1 if w1.dtype == cdt else w1.astype(cdt)
    if (C_in_p, H_p) != w1.shape:
        w1_p = jnp.pad(w1_p, ((0, C_in_p - C_in), (0, H_p - H)))
    w2_p = w2 if w2.dtype == cdt else w2.astype(cdt)
    if (H_p, C_out_p) != w2.shape:
        w2_p = jnp.pad(w2_p, ((0, H_p - H), (0, C_out_p - C_out)))

    b1_p = b1.astype(jnp.float32)
    if H_p != H:
        b1_p = jnp.pad(b1_p, ((0, H_p - H),))
    b1_p = b1_p.reshape(1, H_p)
    b2_p = b2.astype(jnp.float32)
    if C_out_p != C_out:
        b2_p = jnp.pad(b2_p, ((0, C_out_p - C_out),))
    b2_p = b2_p.reshape(1, C_out_p)

    # ---- pallas_call ---------------------------------------------------------
    if fuse_hidden:
        kernel = functools.partial(_mlp_kernel_fused, approx_gelu=approx_gelu)
        out2d = pl.pallas_call(
            kernel,
            out_shape=jax.ShapeDtypeStruct((M_p, C_out_p), out_dtype),
            grid_spec=pltpu.PrefetchScalarGridSpec(
                num_scalar_prefetch=0,
                grid=(n_row_tiles,),
                in_specs=[
                    pl.BlockSpec((tm, C_in_p), lambda i: (i, 0)),     # x tile
                    pl.BlockSpec((C_in_p, H_p), lambda i: (0, 0)),    # w1 (resident)
                    pl.BlockSpec((1, H_p), lambda i: (0, 0)),         # b1
                    pl.BlockSpec((H_p, C_out_p), lambda i: (0, 0)),   # w2 (resident)
                    pl.BlockSpec((1, C_out_p), lambda i: (0, 0)),     # b2
                ],
                out_specs=pl.BlockSpec((tm, C_out_p), lambda i: (i, 0)),
            ),
            compiler_params=pltpu.CompilerParams(
                dimension_semantics=("parallel",),
                vmem_limit_bytes=budget,
            ),
        )(x2d, w1_p, b1_p, w2_p, b2_p)
    else:
        kernel = functools.partial(_mlp_kernel_tiled, approx_gelu=approx_gelu)
        out2d = pl.pallas_call(
            kernel,
            out_shape=jax.ShapeDtypeStruct((M_p, C_out_p), out_dtype),
            grid_spec=pltpu.PrefetchScalarGridSpec(
                num_scalar_prefetch=0,
                grid=(n_row_tiles, H_p // th_eff),
                in_specs=[
                    pl.BlockSpec((tm, C_in_p), lambda i, j: (i, 0)),      # x tile
                    pl.BlockSpec((C_in_p, th_eff), lambda i, j: (0, j)),  # w1 slice
                    pl.BlockSpec((1, th_eff), lambda i, j: (0, j)),       # b1 slice
                    pl.BlockSpec((th_eff, C_out_p), lambda i, j: (j, 0)), # w2 slice
                    pl.BlockSpec((1, C_out_p), lambda i, j: (0, 0)),      # b2
                ],
                out_specs=pl.BlockSpec((tm, C_out_p), lambda i, j: (i, 0)),
                scratch_shapes=[pltpu.VMEM((tm, C_out_p), jnp.float32)],
            ),
            compiler_params=pltpu.CompilerParams(
                dimension_semantics=("parallel", "arbitrary"),
                vmem_limit_bytes=budget,
            ),
        )(x2d, w1_p, b1_p, w2_p, b2_p)

    if (M_p, C_out_p) != (M, C_out):
        out2d = out2d[:M, :C_out]
    return out2d.reshape(B, N, C_out)


def mlp_reference(x, w1, b1, w2, b2):
    h = x @ w1 + b1
    h = 0.5 * h * (1.0 + lax.erf(h * jnp.float32(0.7071067811865476)))
    return h @ w2 + b2


if __name__ == "__main__":
    # Small shapes consistent with the module: tokens (B, N, C_in).
    B, N = 2, 8
    in_features, hidden_features, out_features = 32, 128, 32

    key = jax.random.PRNGKey(0)
    kx, kw1, kb1, kw2, kb2 = jax.random.split(key, 5)

    x = jax.random.normal(kx, (B, N, in_features), dtype=jnp.float32)
    # PyTorch Linear weight is (out, in); stored here pre-transposed as (in, out).
    w1 = jax.random.normal(kw1, (in_features, hidden_features), jnp.float32) * 0.05
    b1 = jax.random.normal(kb1, (hidden_features,), jnp.float32) * 0.01
    w2 = jax.random.normal(kw2, (hidden_features, out_features), jnp.float32) * 0.05
    b2 = jax.random.normal(kb2, (out_features,), jnp.float32) * 0.01

    y_ref = mlp_reference(x, w1, b1, w2, b2)

    # 1) f32 compute (exact torch numerics), fused-weight path -> tight tol.
    y_f32 = jax.block_until_ready(
        mlp_pallas(x, w1, b1, w2, b2, compute_dtype=jnp.float32))
    assert y_f32.shape == (B, N, out_features)
    assert jnp.allclose(y_f32, y_ref, atol=1e-5, rtol=1e-5)

    # 2) default bf16 MXU compute (f32 accumulation) -> looser tolerance.
    y_bf16 = jax.block_until_ready(mlp_pallas(x, w1, b1, w2, b2))
    assert y_bf16.shape == (B, N, out_features)
    assert jnp.allclose(y_bf16, y_ref, atol=5e-2, rtol=5e-2)

    # 3) hidden-tiled (accumulator) path with a ragged token count.
    H2 = 256
    kw3, kb3, kw4, kb4 = jax.random.split(kb2, 4)
    w1b = jax.random.normal(kw3, (in_features, H2), jnp.float32) * 0.05
    b1b = jax.random.normal(kb3, (H2,), jnp.float32) * 0.01
    w2b = jax.random.normal(kw4, (H2, out_features), jnp.float32) * 0.05
    b2b = jax.random.normal(kb4, (out_features,), jnp.float32) * 0.01
    x3 = jax.random.normal(kx, (1, 13, in_features), dtype=jnp.float32)
    y3_ref = mlp_reference(x3, w1b, b1b, w2b, b2b)
    y3 = jax.block_until_ready(
        mlp_pallas(x3, w1b, b1b, w2b, b2b, compute_dtype=jnp.float32, th=128))
    assert y3.shape == (1, 13, out_features)
    assert jnp.allclose(y3, y3_ref, atol=1e-5, rtol=1e-5)

    print("KERNEL_OK")
</pallas_src>

<mosaic_0001>
module attributes {stable_mosaic.version = 11 : i64} {
  func.func @_mlp_kernel_fused(%arg0: i32, %arg1: memref<16x128xf32, #tpu.memory_space<vmem>>, %arg2: memref<128x128xf32, #tpu.memory_space<vmem>>, %arg3: memref<1x128xf32, #tpu.memory_space<vmem>>, %arg4: memref<128x128xf32, #tpu.memory_space<vmem>>, %arg5: memref<1x128xf32, #tpu.memory_space<vmem>>, %arg6: memref<16x128xf32, #tpu.memory_space<vmem>>) attributes {dimension_semantics = [#tpu.dimension_semantics<parallel>], iteration_bounds = array<i64: 1>, scalar_prefetch = 0 : i64, scratch_operands = 0 : i64, tpu.core_type = #tpu.core_type<tc>, window_params = [{transform_indices = @transform_0, window_bounds = array<i64: 16, 128>}, {pipeline_mode = #tpu.pipeline_mode<synchronous>, transform_indices = @transform_1, window_bounds = array<i64: 128, 128>}, {pipeline_mode = #tpu.pipeline_mode<synchronous>, transform_indices = @transform_2, window_bounds = array<i64: 1, 128>}, {pipeline_mode = #tpu.pipeline_mode<synchronous>, transform_indices = @transform_3, window_bounds = array<i64: 128, 128>}, {pipeline_mode = #tpu.pipeline_mode<synchronous>, transform_indices = @transform_4, window_bounds = array<i64: 1, 128>}, {transform_indices = @transform_5, window_bounds = array<i64: 16, 128>}]} {
    %c0 = arith.constant 0 : index
    %c0_0 = arith.constant 0 : index
    %0 = vector.load %arg1[%c0, %c0_0] : memref<16x128xf32, #tpu.memory_space<vmem>>, vector<16x128xf32>
    %c0_1 = arith.constant 0 : index
    %c0_2 = arith.constant 0 : index
    %1 = vector.load %arg2[%c0_1, %c0_2] : memref<128x128xf32, #tpu.memory_space<vmem>>, vector<128x128xf32>
    %cst = arith.constant dense<0.000000e+00> : vector<16x128xf32>
    %2 = tpu.matmul %0, %1, %cst {dimension_numbers = #tpu.dot_dimension_numbers<[1], [0], [0], [1], [0, 0, 1, 1], [], []>} : vector<16x128xf32>, vector<128x128xf32>, vector<16x128xf32> -> vector<16x128xf32>
    %c0_3 = arith.constant 0 : index
    %c0_4 = arith.constant 0 : index
    %3 = vector.load %arg3[%c0_3, %c0_4] : memref<1x128xf32, #tpu.memory_space<vmem>>, vector<1x128xf32>
    %4 = vector.broadcast %3 : vector<1x128xf32> to vector<16x128xf32>
    %5 = arith.addf %2, %4 : vector<16x128xf32>
    %cst_5 = arith.constant 5.000000e-01 : f32
    %6 = vector.broadcast %cst_5 : f32 to vector<16x128xf32>
    %7 = arith.mulf %6, %5 : vector<16x128xf32>
    %cst_6 = arith.constant 0.707106769 : f32
    %8 = vector.broadcast %cst_6 : f32 to vector<16x128xf32>
    %9 = arith.mulf %5, %8 : vector<16x128xf32>
    %10 = math.erf %9 : vector<16x128xf32>
    %cst_7 = arith.constant 1.000000e+00 : f32
    %11 = vector.broadcast %cst_7 : f32 to vector<16x128xf32>
    %12 = arith.addf %11, %10 : vector<16x128xf32>
    %13 = arith.mulf %7, %12 : vector<16x128xf32>
    %c0_8 = arith.constant 0 : index
    %c0_9 = arith.constant 0 : index
    %14 = vector.load %arg4[%c0_8, %c0_9] : memref<128x128xf32, #tpu.memory_space<vmem>>, vector<128x128xf32>
    %cst_10 = arith.constant dense<0.000000e+00> : vector<16x128xf32>
    %15 = tpu.matmul %13, %14, %cst_10 {dimension_numbers = #tpu.dot_dimension_numbers<[1], [0], [0], [1], [0, 0, 1, 1], [], []>} : vector<16x128xf32>, vector<128x128xf32>, vector<16x128xf32> -> vector<16x128xf32>
    %c0_11 = arith.constant 0 : index
    %c0_12 = arith.constant 0 : index
    %16 = vector.load %arg5[%c0_11, %c0_12] : memref<1x128xf32, #tpu.memory_space<vmem>>, vector<1x128xf32>
    %17 = vector.broadcast %16 : vector<1x128xf32> to vector<16x128xf32>
    %18 = arith.addf %15, %17 : vector<16x128xf32>
    %c0_13 = arith.constant 0 : index
    %c0_14 = arith.constant 0 : index
    %19 = vector.load %arg6[%c0_13, %c0_14] : memref<16x128xf32, #tpu.memory_space<vmem>>, vector<16x128xf32>
    tpu.vector_store %arg6[%c0_13, %c0_14], %18 {strides = array<i32>} : memref<16x128xf32, #tpu.memory_space<vmem>>, vector<16x128xf32>,
    return
  }
  func.func @transform_0(%arg0: i32) -> (i32, i32) {
    %c0_i32 = arith.constant 0 : i32
    %c0_i32_0 = arith.constant 0 : i32
    return %arg0, %c0_i32 : i32, i32
  }
  func.func @transform_1(%arg0: i32) -> (i32, i32) {
    %c0_i32 = arith.constant 0 : i32
    %c0_i32_0 = arith.constant 0 : i32
    %c0_i32_1 = arith.constant 0 : i32
    return %c0_i32, %c0_i32_0 : i32, i32
  }
  func.func @transform_2(%arg0: i32) -> (i32, i32) {
    %c0_i32 = arith.constant 0 : i32
    %c0_i32_0 = arith.constant 0 : i32
    %c0_i32_1 = arith.constant 0 : i32
    return %c0_i32, %c0_i32_0 : i32, i32
  }
  func.func @transform_3(%arg0: i32) -> (i32, i32) {
    %c0_i32 = arith.constant 0 : i32
    %c0_i32_0 = arith.constant 0 : i32
    %c0_i32_1 = arith.constant 0 : i32
    return %c0_i32, %c0_i32_0 : i32, i32
  }
  func.func @transform_4(%arg0: i32) -> (i32, i32) {
    %c0_i32 = arith.constant 0 : i32
    %c0_i32_0 = arith.constant 0 : i32
    %c0_i32_1 = arith.constant 0 : i32
    return %c0_i32, %c0_i32_0 : i32, i32
  }
  func.func @transform_5(%arg0: i32) -> (i32, i32) {
    %c0_i32 = arith.constant 0 : i32
    %c0_i32_0 = arith.constant 0 : i32
    return %arg0, %c0_i32 : i32, i32
  }
}

</mosaic_0001>

<bundles_post_ra>
// kernel: mlp_pallas.1
= control target key start
LH: loop header
LB: loop body
LE: loop exit
PB: predicated region body
PF: predicated region fallthrough
CT: control target
= control target key end

     0   :  { %s490_s1 = inlined_call_operand.vmem [shape: f32[128,128], index: 1, kind: input, shape index: {}]   ;;  %s491_s0 = inlined_call_operand.vmem [shape: f32[16,128], index: 0, kind: input, shape index: {}]   ;;  %s492_s3 = inlined_call_operand.vmem [shape: f32[128,128], index: 3, kind: input, shape index: {}]   ;;  %s493_s2 = inlined_call_operand.vmem [shape: f32[1,128], index: 2, kind: input, shape index: {}]   ;;  %s494_s4 = inlined_call_operand.vmem [shape: f32[1,128], index: 4, kind: input, shape index: {}]   ;;  %s495_s5 = inlined_call_operand.vmem [shape: f32[16,128], index: 5, kind: output, shape index: {}]  }
   0x1   :  { %v37_v0 = vld [vmem:[%s490_s1 + $0x78] sm:$0xff]  ;;  %v36_v1 = vld [vmem:[%s490_s1 + $0x70] sm:$0xff]  ;;  %v35_v2 = vld [vmem:[%s490_s1 + $0x68] sm:$0xff] }
   0x2   :  { %272 = vmatprep.subr.mxu0 %v37_v0  ;;  %v34_v3 = vld [vmem:[%s490_s1 + $0x60] sm:$0xff]  ;;  %v33_v5 = vld [vmem:[%s490_s1 + $0x58] sm:$0xff]  ;;  %v144_v7 = vld [vmem:[%s492_s3 + $0x70] sm:$0xff] }
   0x3   :  { %273 = vmatpush3.msra.mxu0 %v37_v0  ;;  %v20_v4 = vld [vmem:[%s491_s0] sm:$0xff]  ;;  %v145_v6 = vld [vmem:[%s492_s3 + $0x78] sm:$0xff]  ;;  %v32_v8 = vld [vmem:[%s490_s1 + $0x50] sm:$0xff] }
   0x4   :  { %274 = vmatprep.subr.mxu0 %v36_v1  ;;  %304 = vmatprep.mubr.f32.mxu0 %v20_v4  ;;  %v143_v9 = vld [vmem:[%s492_s3 + $0x68] sm:$0xff]  ;;  %v30_v11 = vld [vmem:[%s490_s1 + $0x40] sm:$0xff]  ;;  %v29_v12 = vld [vmem:[%s490_s1 + $0x38] sm:$0xff] }
   0x5   :  { %275 = vmatpush3.msra.mxu0 %v36_v1  ;;  %307 = vmatprep.subr.mxu1 %v145_v6  ;;  %v31_v10 = vld [vmem:[%s490_s1 + $0x48] sm:$0xff]  ;;  %v28_v13 = vld [vmem:[%s490_s1 + $0x30] sm:$0xff]  ;;  %v26_v15 = vld [vmem:[%s490_s1 + $0x20] sm:$0xff] }
   0x6   :  { %276 = vmatprep.subr.mxu0 %v35_v2  ;;  %308 = vmatpush3.msra.mxu1 %v145_v6  ;;  %v27_v14 = vld [vmem:[%s490_s1 + $0x28] sm:$0xff]  ;;  %v25_v16 = vld [vmem:[%s490_s1 + $0x18] sm:$0xff]  ;;  %v24_v17 = vld [vmem:[%s490_s1 + $0x10] sm:$0xff] }
   0x7   :  { %277 = vmatpush3.msra.mxu0 %v35_v2  ;;  %309 = vmatprep.subr.mxu1 %v144_v7  ;;  %v23_v18 = vld [vmem:[%s490_s1 + $0x8] sm:$0xff]  ;;  %v22_v19 = vld [vmem:[%s490_s1] sm:$0xff]  ;;  %v141_v22 = vld [vmem:[%s492_s3 + $0x58] sm:$0xff] }
   0x8   :  { %278 = vmatprep.subr.mxu0 %v34_v3  ;;  %310 = vmatpush3.msra.mxu1 %v144_v7  ;;  %v21_v20 = vld [vmem:[%s491_s0 + $0x8] sm:$0xff]  ;;  %v142_v21 = vld [vmem:[%s492_s3 + $0x60] sm:$0xff]  ;;  %v140_v23 = vld [vmem:[%s492_s3 + $0x50] sm:$0xff] }
   0x9   :  { %279 = vmatpush3.msra.mxu0 %v34_v3  ;;  %311 = vmatprep.subr.mxu1 %v143_v9  ;;  %v139_v24 = vld [vmem:[%s492_s3 + $0x48] sm:$0xff]  ;;  %v138_v25 = vld [vmem:[%s492_s3 + $0x40] sm:$0xff]  ;;  %v137_v26 = vld [vmem:[%s492_s3 + $0x38] sm:$0xff] }
   0xa   :  { %280 = vmatprep.subr.mxu0 %v33_v5  ;;  %312 = vmatpush3.msra.mxu1 %v143_v9  ;;  %v136_v27 = vld [vmem:[%s492_s3 + $0x30] sm:$0xff]  ;;  %v135_v28 = vld [vmem:[%s492_s3 + $0x28] sm:$0xff]  ;;  %v134_v29 = vld [vmem:[%s492_s3 + $0x20] sm:$0xff] }
   0xb   :  { %281 = vmatpush3.msra.mxu0 %v33_v5  ;;  %313 = vmatprep.subr.mxu1 %v142_v21  ;;  %v133_v30 = vld [vmem:[%s492_s3 + $0x18] sm:$0xff]  ;;  %v132_v31 = vld [vmem:[%s492_s3 + $0x10] sm:$0xff]  ;;  %v131_v32 = vld [vmem:[%s492_s3 + $0x8] sm:$0xff] }
   0xc   :  { %282 = vmatprep.subr.mxu0 %v32_v8  ;;  %314 = vmatpush3.msra.mxu1 %v142_v21  ;;  %v130_v33 = vld [vmem:[%s492_s3] sm:$0xff] }
   0xd   :  { %283 = vmatpush3.msra.mxu0 %v32_v8  ;;  %315 = vmatprep.subr.mxu1 %v141_v22  ;;  %v234_v34 = vld [vmem:[%s493_s2] ss:$0 sm:$0xff] }
   0xe   :  { %284 = vmatprep.subr.mxu0 %v31_v10  ;;  %316 = vmatpush3.msra.mxu1 %v141_v22  ;;  %v235_v49 = vld [vmem:[%s494_s4] ss:$0 sm:$0xff] }
   0xf   :  { %285 = vmatpush3.msra.mxu0 %v31_v10  ;;  %317 = vmatprep.subr.mxu1 %v140_v23 }
  0x10   :  { %286 = vmatprep.subr.mxu0 %v30_v11  ;;  %318 = vmatpush3.msra.mxu1 %v140_v23 }
  0x11   :  { %287 = vmatpush3.msra.mxu0 %v30_v11  ;;  %319 = vmatprep.subr.mxu1 %v139_v24 }
  0x12   :  { %288 = vmatprep.subr.mxu0 %v29_v12  ;;  %320 = vmatpush3.msra.mxu1 %v139_v24 }
  0x13   :  { %289 = vmatpush3.msra.mxu0 %v29_v12  ;;  %321 = vmatprep.subr.mxu1 %v138_v25 }
  0x14   :  { %290 = vmatprep.subr.mxu0 %v28_v13  ;;  %322 = vmatpush3.msra.mxu1 %v138_v25 }
  0x15   :  { %291 = vmatpush3.msra.mxu0 %v28_v13  ;;  %323 = vmatprep.subr.mxu1 %v137_v26 }
  0x16   :  { %292 = vmatprep.subr.mxu0 %v27_v14  ;;  %324 = vmatpush3.msra.mxu1 %v137_v26 }
  0x17   :  { %293 = vmatpush3.msra.mxu0 %v27_v14  ;;  %325 = vmatprep.subr.mxu1 %v136_v27 }
  0x18   :  { %294 = vmatprep.subr.mxu0 %v26_v15  ;;  %326 = vmatpush3.msra.mxu1 %v136_v27 }
  0x19   :  { %295 = vmatpush3.msra.mxu0 %v26_v15  ;;  %327 = vmatprep.subr.mxu1 %v135_v28 }
  0x1a   :  { %296 = vmatprep.subr.mxu0 %v25_v16  ;;  %328 = vmatpush3.msra.mxu1 %v135_v28 }
  0x1b   :  { %297 = vmatpush3.msra.mxu0 %v25_v16  ;;  %329 = vmatprep.subr.mxu1 %v134_v29 }
  0x1c   :  { %298 = vmatprep.subr.mxu0 %v24_v17  ;;  %330 = vmatpush3.msra.mxu1 %v134_v29 }
  0x1d   :  { %299 = vmatpush3.msra.mxu0 %v24_v17  ;;  %331 = vmatprep.subr.mxu1 %v133_v30 }
  0x1e   :  { %300 = vmatprep.subr.mxu0 %v23_v18  ;;  %332 = vmatpush3.msra.mxu1 %v133_v30 }
  0x1f   :  { %301 = vmatpush3.msra.mxu0 %v23_v18  ;;  %333 = vmatprep.subr.mxu1 %v132_v31 }
  0x20   :  { %302 = vmatprep.subr.mxu0 %v22_v19  ;;  %334 = vmatpush3.msra.mxu1 %v132_v31 }
  0x21   :  { %303 = vmatpush3.msra.mxu0 %v22_v19  ;;  %335 = vmatprep.subr.mxu1 %v131_v32 }
  0x22   :  { %305 = vmatmul.mubr.f32.vlgmr.msra.gmra.mxu0 %v21_v20  ;;  %336 = vmatpush3.msra.mxu1 %v131_v32 }
  0x23   :  { %337 = vmatprep.subr.mxu1 %v130_v33 }
  0x24   :  { %338 = vmatpush3.msra.mxu1 %v130_v33 }
  0xe2   :  { %v306_v35 = vpop.f32.mrf.mxu0 }
  0xe3   :  { %v117_v36 = vadd.f32 %v306_v35, %v234_v34 }
  0xe4   :  { %v111_v37 = vpop.f32.mrf.mxu0 }
  0xe5   :  { %v123_v38 = vmul.f32 0.70710677, %v117_v36  ;;  %v112_v39 = vadd.f32 %v234_v34, %v111_v37  ;;  %v121_v46 = vmul.f32 0.5, %v117_v36 }
  0xe7   :  { %342 = verf.f32 %v123_v38  ;;  %v122_v40 = vmul.f32 0.70710677, %v112_v39  ;;  %v120_v44 = vmul.f32 0.5, %v112_v39 }
  0xe9   :  { %344 = verf.f32 %v122_v40 }
  0xf4   :  { %v343_v41 = vpop.eup %342 }
  0xf5   :  { %v127_v43 = vadd.f32 1.0, %v343_v41 }
  0xf6   :  { %v345_v42 = vpop.eup %344 }
  0xf7   :  { %v126_v45 = vadd.f32 1.0, %v345_v42  ;;  %v129_v48 = vmul.f32 %v127_v43, %v121_v46 }
  0xf9   :  { %v128_v47 = vmul.f32 %v126_v45, %v120_v44 }
  0xfb   :  { %339 = vmatprep.mubr.f32.mxu1 %v128_v47 }
  0xfc   :  { %340 = vmatmul.mubr.f32.vlgmr.msra.gmra.mxu1 %v129_v48 }
 0x1bc   :  { %v341_v50 = vpop.f32.mrf.mxu1 }
 0x1bd   :  { %v225_v51 = vadd.f32 %v341_v50, %v235_v49 }
 0x1be   :  { %v219_v52 = vpop.f32.mrf.mxu1 }
 0x1bf   :  { %229 = vst [vmem:[%s495_s5 + $0x8] sm:$0xff] %v225_v51  ;;  %v220_v53 = vadd.f32 %v235_v49, %v219_v52 }
 0x1c1   :  { %228 = vst [vmem:[%s495_s5] sm:$0xff] %v220_v53 }

</bundles_post_ra>
